<compile_context>
chip_gen: v6e
topology: v6e:2x2x1
jax: 0.10.0
libtpu: 0.0.40
codegen_flags: <defaults>
</compile_context>

<pallas_src>
import jax
import jax.numpy as jnp
from jax.experimental import pallas as pl
from jax.experimental.pallas import tpu as pltpu


def _sigmoid_tanh(x):
    # sigmoid(x) == 0.5 * (tanh(0.5 * x) + 1): single EUP op per element.
    return 0.5 * (jnp.tanh(0.5 * x) + 1.0)


def _attention_kernel(x_ref, w1_ref, b1_ref, w2_ref, b2_ref, o_ref):
    # Layer 1 on the MXU: (TM, D) @ (D, 64), bf16 operands, f32 accumulation.
    h = jnp.dot(x_ref[...], w1_ref[...], preferred_element_type=jnp.float32)
    h = _sigmoid_tanh(h + b1_ref[...].astype(jnp.float32))        # (TM, 64)

    # Layer 2 (64 -> 1) as VPU multiply + 64-lane reduce instead of an N=1
    # MXU matmul; w2 arrives as a (1, 64) f32 row.
    w2 = w2_ref[...]                                               # (1, 64) f32
    logits = jnp.sum(h * w2, axis=-1)                              # (TM,)
    logits = logits + b2_ref[0, 0]                                 # SMEM scalar bias

    # Lane-dense store: one (1, TM) row per grid step.
    o_ref[...] = _sigmoid_tanh(logits).reshape(1, -1).astype(o_ref.dtype)


def _round_up(n, m):
    return ((n + m - 1) // m) * m


def _choose_tile(batch, block_rows):
    """Pick the batch tile: lane-dense (multiple of 128), as large as the
    block_rows cap allows, but with >= 2 grid steps whenever B > 128 so both
    TensorCores get work on v7x."""
    if batch <= 128:
        return 128
    half = _round_up((batch + 1) // 2, 128)      # saturate B in two steps
    return min(_round_up(block_rows, 128), half)


def attention_forward(x, w1, b1, w2, b2, *, block_rows=8192,
                      compute_dtype=jnp.bfloat16):
    """x: (B, D); w1: (D, 64); b1: (1, 64); w2: (64, 1); b2: (1, 1) -> (B, 1).

    Weights are stored already-transposed relative to torch.nn.Linear, i.e.
    (in_features, out_features), so the kernel does plain x @ W + b.
    x and w1 are cast to `compute_dtype` (default bf16) for the MXU; the
    accumulation, biases and activations stay f32. Pass compute_dtype=
    jnp.float32 for bit-tight agreement with an f32 reference (then consider
    lowering block_rows on v5e's 16 MiB scoped-VMEM default).
    """
    B, D = x.shape
    H = w1.shape[1]  # 64

    tm = _choose_tile(B, block_rows)
    b_pad = _round_up(B, tm)
    x_p = x if b_pad == B else jnp.pad(x, ((0, b_pad - B), (0, 0)))

    x_c = x_p.astype(compute_dtype)                     # HBM-significant operand
    w1_c = w1.astype(compute_dtype)                     # matmul peer, VMEM-resident
    b1_f = jnp.reshape(b1, (1, H)).astype(jnp.float32)  # f32, VMEM-resident
    w2_row = jnp.reshape(w2, (1, H)).astype(jnp.float32)  # (1, 64) row for VPU reduce
    b2_s = jnp.reshape(b2, (1, 1)).astype(jnp.float32)    # SMEM scalar

    grid = (b_pad // tm,)
    out_row = pl.pallas_call(
        _attention_kernel,
        out_shape=jax.ShapeDtypeStruct((1, b_pad), x.dtype),
        grid_spec=pltpu.PrefetchScalarGridSpec(
            num_scalar_prefetch=0,
            grid=grid,
            in_specs=[
                pl.BlockSpec((tm, D), lambda i: (i, 0)),   # x tile, double-buffered
                pl.BlockSpec((D, H), lambda i: (0, 0)),    # w1, VMEM-resident
                pl.BlockSpec((1, H), lambda i: (0, 0)),    # b1, VMEM-resident
                pl.BlockSpec((1, H), lambda i: (0, 0)),    # w2 row, VMEM-resident
                pl.BlockSpec(memory_space=pltpu.MemorySpace.SMEM),  # b2 scalar
            ],
            out_specs=pl.BlockSpec((1, tm), lambda i: (0, i)),  # lane-dense row
        ),
        compiler_params=pltpu.CompilerParams(
            dimension_semantics=("parallel",),  # shard batch tiles across TCs
        ),
    )(x_c, w1_c, b1_f, w2_row, b2_s)

    # Free layout plumbing back to the PyTorch (B, 1) shape; drops padded rows.
    return out_row[0, :B].reshape(B, 1)


def init_attention_params(key, last_layer_size, dtype=jnp.float32):
    """Deterministic synthetic init matching nn.Linear parameter shapes.

    PyTorch stores weight as (out, in); we keep the transposed (in, out) form
    so the kernel multiplies without a transpose.
    """
    k1, k2, k3, k4 = jax.random.split(key, 4)
    bound1 = 1.0 / jnp.sqrt(last_layer_size)
    bound2 = 1.0 / jnp.sqrt(64.0)
    w1 = jax.random.uniform(k1, (last_layer_size, 64), dtype, -bound1, bound1)
    b1 = jax.random.uniform(k2, (1, 64), dtype, -bound1, bound1)
    w2 = jax.random.uniform(k3, (64, 1), dtype, -bound2, bound2)
    b2 = jax.random.uniform(k4, (1, 1), dtype, -bound2, bound2)
    return w1, b1, w2, b2


def _reference(x, w1, b1, w2, b2):
    return jax.nn.sigmoid(jax.nn.sigmoid(x @ w1 + b1) @ w2 + b2)


if __name__ == "__main__":
    key = jax.random.PRNGKey(0)
    kx, kp, kx2 = jax.random.split(key, 3)

    last_layer_size = 32
    w1, b1, w2, b2 = init_attention_params(kp, last_layer_size)

    # bf16 inputs -> ~1e-3 abs deviation from the f32 reference; sigmoid output
    # lives in (0, 1) so a 1e-2 tolerance is comfortably tight.
    ATOL, RTOL = 1e-2, 1e-2

    # Small case (single tile, padded batch).
    batch = 8
    x = jax.random.normal(kx, (batch, last_layer_size), jnp.float32)
    out = jax.block_until_ready(attention_forward(x, w1, b1, w2, b2))
    ref = _reference(x, w1, b1, w2, b2)
    assert out.shape == (batch, 1)
    assert jnp.allclose(out, ref, atol=ATOL, rtol=RTOL)

    # Larger case exercising the multi-step grid (2 tiles -> both TCs on v7x)
    # and the padding/slice path.
    batch2 = 1000
    x2 = jax.random.normal(kx2, (batch2, last_layer_size), jnp.float32)
    out2 = jax.block_until_ready(attention_forward(x2, w1, b1, w2, b2))
    ref2 = _reference(x2, w1, b1, w2, b2)
    assert out2.shape == (batch2, 1)
    assert jnp.allclose(out2, ref2, atol=ATOL, rtol=RTOL)

    print("KERNEL_OK")
</pallas_src>

<mosaic_0001>
module attributes {stable_mosaic.version = 11 : i64} {
  func.func @_attention_kernel(%arg0: i32, %arg1: memref<128x32xbf16, #tpu.memory_space<vmem>>, %arg2: memref<32x64xbf16, #tpu.memory_space<vmem>>, %arg3: memref<1x64xf32, #tpu.memory_space<vmem>>, %arg4: memref<1x64xf32, #tpu.memory_space<vmem>>, %arg5: memref<1x1xf32, #tpu.memory_space<smem>>, %arg6: memref<1x128xf32, #tpu.memory_space<vmem>>) attributes {dimension_semantics = [#tpu.dimension_semantics<parallel>], iteration_bounds = array<i64: 1>, scalar_prefetch = 0 : i64, scratch_operands = 0 : i64, tpu.core_type = #tpu.core_type<tc>, window_params = [{transform_indices = @transform_0, window_bounds = array<i64: 128, 32>}, {pipeline_mode = #tpu.pipeline_mode<synchronous>, transform_indices = @transform_1, window_bounds = array<i64: 32, 64>}, {pipeline_mode = #tpu.pipeline_mode<synchronous>, transform_indices = @transform_2, window_bounds = array<i64: 1, 64>}, {pipeline_mode = #tpu.pipeline_mode<synchronous>, transform_indices = @transform_3, window_bounds = array<i64: 1, 64>}, {transform_indices = @transform_4, window_bounds = array<i64: 1, 1>}, {transform_indices = @transform_5, window_bounds = array<i64: 1, 128>}]} {
    %c0 = arith.constant 0 : index
    %c0_0 = arith.constant 0 : index
    %0 = vector.load %arg1[%c0, %c0_0] : memref<128x32xbf16, #tpu.memory_space<vmem>>, vector<128x32xbf16>
    %c0_1 = arith.constant 0 : index
    %c0_2 = arith.constant 0 : index
    %1 = vector.load %arg2[%c0_1, %c0_2] : memref<32x64xbf16, #tpu.memory_space<vmem>>, vector<32x64xbf16>
    %cst = arith.constant dense<0.000000e+00> : vector<128x64xf32>
    %2 = tpu.matmul %0, %1, %cst {dimension_numbers = #tpu.dot_dimension_numbers<[1], [0], [0], [1], [0, 0, 1, 1], [], []>} : vector<128x32xbf16>, vector<32x64xbf16>, vector<128x64xf32> -> vector<128x64xf32>
    %c0_3 = arith.constant 0 : index
    %c0_4 = arith.constant 0 : index
    %3 = vector.load %arg3[%c0_3, %c0_4] : memref<1x64xf32, #tpu.memory_space<vmem>>, vector<1x64xf32>
    %4 = vector.broadcast %3 : vector<1x64xf32> to vector<128x64xf32>
    %5 = arith.addf %2, %4 : vector<128x64xf32>
    %cst_5 = arith.constant 5.000000e-01 : f32
    %6 = vector.broadcast %cst_5 : f32 to vector<128x64xf32>
    %7 = arith.mulf %6, %5 : vector<128x64xf32>
    %8 = math.tanh %7 : vector<128x64xf32>
    %cst_6 = arith.constant 1.000000e+00 : f32
    %9 = vector.broadcast %cst_6 : f32 to vector<128x64xf32>
    %10 = arith.addf %8, %9 : vector<128x64xf32>
    %cst_7 = arith.constant 5.000000e-01 : f32
    %11 = vector.broadcast %cst_7 : f32 to vector<128x64xf32>
    %12 = arith.mulf %11, %10 : vector<128x64xf32>
    %c0_8 = arith.constant 0 : index
    %c0_9 = arith.constant 0 : index
    %13 = vector.load %arg4[%c0_8, %c0_9] : memref<1x64xf32, #tpu.memory_space<vmem>>, vector<1x64xf32>
    %14 = vector.broadcast %13 : vector<1x64xf32> to vector<128x64xf32>
    %15 = arith.mulf %12, %14 : vector<128x64xf32>
    %cst_10 = arith.constant dense<0.000000e+00> : vector<128xf32>
    %16 = vector.multi_reduction <add>, %15, %cst_10 [1] : vector<128x64xf32> to vector<128xf32>
    %c0_11 = arith.constant 0 : index
    %c0_12 = arith.constant 0 : index
    %17 = memref.load %arg5[%c0_11, %c0_12] : memref<1x1xf32, #tpu.memory_space<smem>>
    %18 = vector.broadcast %17 : f32 to vector<128xf32>
    %19 = arith.addf %16, %18 : vector<128xf32>
    %cst_13 = arith.constant 5.000000e-01 : f32
    %20 = vector.broadcast %cst_13 : f32 to vector<128xf32>
    %21 = arith.mulf %20, %19 : vector<128xf32>
    %22 = math.tanh %21 : vector<128xf32>
    %cst_14 = arith.constant 1.000000e+00 : f32
    %23 = vector.broadcast %cst_14 : f32 to vector<128xf32>
    %24 = arith.addf %22, %23 : vector<128xf32>
    %cst_15 = arith.constant 5.000000e-01 : f32
    %25 = vector.broadcast %cst_15 : f32 to vector<128xf32>
    %26 = arith.mulf %25, %24 : vector<128xf32>
    %27 = vector.shape_cast %26 : vector<128xf32> to vector<1x128xf32>
    %c0_16 = arith.constant 0 : index
    %c0_17 = arith.constant 0 : index
    %28 = vector.load %arg6[%c0_16, %c0_17] : memref<1x128xf32, #tpu.memory_space<vmem>>, vector<1x128xf32>
    tpu.vector_store %arg6[%c0_16, %c0_17], %27 {strides = array<i32>} : memref<1x128xf32, #tpu.memory_space<vmem>>, vector<1x128xf32>,
    return
  }
  func.func @transform_0(%arg0: i32) -> (i32, i32) {
    %c0_i32 = arith.constant 0 : i32
    %c0_i32_0 = arith.constant 0 : i32
    return %arg0, %c0_i32 : i32, i32
  }
  func.func @transform_1(%arg0: i32) -> (i32, i32) {
    %c0_i32 = arith.constant 0 : i32
    %c0_i32_0 = arith.constant 0 : i32
    %c0_i32_1 = arith.constant 0 : i32
    return %c0_i32, %c0_i32_0 : i32, i32
  }
  func.func @transform_2(%arg0: i32) -> (i32, i32) {
    %c0_i32 = arith.constant 0 : i32
    %c0_i32_0 = arith.constant 0 : i32
    %c0_i32_1 = arith.constant 0 : i32
    return %c0_i32, %c0_i32_0 : i32, i32
  }
  func.func @transform_3(%arg0: i32) -> (i32, i32) {
    %c0_i32 = arith.constant 0 : i32
    %c0_i32_0 = arith.constant 0 : i32
    %c0_i32_1 = arith.constant 0 : i32
    return %c0_i32, %c0_i32_0 : i32, i32
  }
  func.func @transform_4(%arg0: i32) -> (i32, i32) {
    %c0_i32 = arith.constant 0 : i32
    %c0_i32_0 = arith.constant 0 : i32
    %c0_i32_1 = arith.constant 0 : i32
    return %c0_i32, %c0_i32_0 : i32, i32
  }
  func.func @transform_5(%arg0: i32) -> (i32, i32) {
    %c0_i32 = arith.constant 0 : i32
    %c0_i32_0 = arith.constant 0 : i32
    return %c0_i32, %arg0 : i32, i32
  }
}

</mosaic_0001>

<bundles_post_ra>
// kernel: tpu_custom_call.1
= control target key start
LH: loop header
LB: loop body
LE: loop exit
PB: predicated region body
PF: predicated region fallthrough
CT: control target
= control target key end

     0   :  { %vm102_vm0 = vcmask 261120   ;;  %s954_s0 = inlined_call_operand.vmem [shape: bf16[128,32], index: 0, kind: input, shape index: {}]   ;;  %s955_s1 = inlined_call_operand.vmem [shape: bf16[32,64], index: 1, kind: input, shape index: {}]   ;;  %s956_s2 = inlined_call_operand.vmem [shape: f32[1,64], index: 2, kind: input, shape index: {}]   ;;  %s957_s3 = inlined_call_operand.vmem [shape: f32[1,64], index: 3, kind: input, shape index: {}]   ;;  %s958_s4 = inlined_call_operand.<no memory space> [shape: f32[1,1], index: 4, kind: input, shape index: {}]   ;;  %s959_s5 = inlined_call_operand.hbm [shape: f32[1,128], index: 5, kind: output, shape index: {}]  }
   0x1   :  { %v640_v0 = vld [vmem:[%s955_s1 + $0x8] sm:$0xff]   ;;  %v641_v1 = vld [vmem:[%s955_s1] sm:$0xff]   ;;  %v646_v6 = vld [vmem:[%s954_s0 + $0x10] sm:$0xff]  }
   0x2   :  { %615 = vmatprep.subr.bf16.mxu0 %v640_v0  ;;  %635 = vmatprep.subr.bf16.mxu1 %v640_v0  ;;  %v642_v2 = vld [vmem:[%s954_s0] sm:$0xff]   ;;  %v644_v4 = vld [vmem:[%s954_s0 + $0x8] sm:$0xff]   ;;  %v648_v7 = vld [vmem:[%s954_s0 + $0x30] sm:$0xff]  }
   0x3   :  { %616 = vmatpush3.bf16.msra.mxu0 %v640_v0  ;;  %637 = vmatpush3.bf16.msra.mxu1 %v640_v0  ;;  %v643_v3 = vld [vmem:[%s954_s0 + $0x20] sm:$0xff]   ;;  %v645_v5 = vld [vmem:[%s954_s0 + $0x28] sm:$0xff]  }
   0x4   :  { %617 = vmatprep.subr.bf16.mxu0 %v641_v1  ;;  %636 = vmatprep.subr.bf16.mxu1 %v641_v1 }
   0x5   :  { %619 = vmatprep.mubr.msk.bf16.mxu0 %vm102_vm0, %v642_v2  ;;  %627 = vmatprep.mubr.msk.bf16.mxu1 %vm102_vm0, %v643_v3 }
   0x7   :  { %618 = vmatpush3.bf16.msra.mxu0 %v641_v1  ;;  %638 = vmatpush3.bf16.msra.mxu1 %v641_v1 }
   0xa   :  { %620 = vmatmul.mubr.msk.bf16.vlgmr.msra.gmra.mxu0 %vm102_vm0, %v644_v4  ;;  %628 = vmatmul.mubr.msk.bf16.vlgmr.msra.gmra.mxu1 %vm102_vm0, %v645_v5 }
   0xb   :  { %11 = vsyncpa [#allocation4], 0  ;;  %623 = vmatprep.mubr.msk.bf16.mxu0 %vm102_vm0, %v646_v6  ;;  %631 = vmatprep.mubr.msk.bf16.mxu1 %vm102_vm0, %v648_v7  ;;  %v647_v8 = vld [vmem:[%s954_s0 + $0x18] sm:$0xff]   ;;  %v585_v10 = vld [vmem:[%s956_s2] ss:$0 sm:$0xff]  ;;  %vm311_vm1 = vcmask 523264  }
   0xc   :  { %v649_v9 = vld [vmem:[%s954_s0 + $0x38] sm:$0xff]   ;;  %v811_v61 = vld [vmem:[%s957_s3] ss:$0 sm:$0xff]  ;;  %vm469_vm2 = vcmask 130112   ;;  %vm476_vm3 = vcmask 195712   ;;  %vm483_vm4 = vcmask 261312  }
   0xd   :  { %vm490_vm5 = vcmask 326912   ;;  %vm497_vm6 = vcmask 392512   ;;  %vm504_vm7 = vcmask 458112   ;;  %vm511_vm8 = vcmask 523712  }
   0xe   :  { %vm518_vm9 = vcmask 589312   ;;  %vm525_vm10 = vcmask 654912   ;;  %vm532_vm11 = vcmask 720512   ;;  %vm539_vm12 = vcmask 786112  }
   0xf   :  { %vm546_vm13 = vcmask 851712   ;;  %vm553_vm14 = vcmask 917312   ;;  %vm560_vm15 = vcmask 982912  }
  0x12   :  { %624 = vmatmul.mubr.msk.bf16.gmra.mxu0 %vm102_vm0, %v647_v8  ;;  %632 = vmatmul.mubr.msk.bf16.gmra.mxu1 %vm102_vm0, %v649_v9  ;;  %vm567_vm0 = vcmask 1048512  }
  0xca   :  { %v621_v11 = vpop.f32.mrf.mxu0  ;;  %v629_v12 = vpop.f32.mrf.mxu1 }
  0xcb   :  { %v170_v13 = vadd.f32 %v621_v11, %v585_v10  ;;  %v202_v35 = vadd.f32 %v629_v12, %v585_v10 }
  0xcc   :  { %v161_v14 = vpop.f32.mrf.mxu0  ;;  %v193_v15 = vpop.f32.mrf.mxu1 }
  0xcd   :  { %v226_v16 = vmul.f32 0.5, %v170_v13  ;;  %v162_v17 = vadd.f32 %v585_v10, %v161_v14  ;;  %v194_v18 = vadd.f32 %v585_v10, %v193_v15  ;;  %v234_v45 = vmul.f32 0.5, %v202_v35 }
  0xce   :  { %v622_v19 = vpop.f32.mrf.mxu0  ;;  %v630_v20 = vpop.f32.mrf.mxu1 }
  0xcf   :  { %650 = vtanh.f32 %v226_v16  ;;  %v224_v21 = vmul.f32 0.5, %v162_v17  ;;  %v232_v22 = vmul.f32 0.5, %v194_v18  ;;  %v173_v23 = vadd.f32 %v622_v19, %v585_v10 }
  0xd0   :  { %v164_v24 = vpop.f32.mrf.mxu0  ;;  %v196_v25 = vpop.f32.mrf.mxu1  ;;  %v205_v29 = vadd.f32 %v630_v20, %v585_v10 }
  0xd1   :  { %652 = vtanh.f32 %v224_v21  ;;  %v227_v26 = vmul.f32 0.5, %v173_v23  ;;  %v165_v27 = vadd.f32 %v585_v10, %v164_v24  ;;  %v197_v28 = vadd.f32 %v585_v10, %v196_v25 }
  0xd2   :  { %654 = vtanh.f32 %v232_v22  ;;  %v625_v30 = vpop.f32.mrf.mxu0  ;;  %v633_v31 = vpop.f32.mrf.mxu1  ;;  %v235_v40 = vmul.f32 0.5, %v205_v29 }
  0xd3   :  { %656 = vtanh.f32 %v227_v26  ;;  %v225_v32 = vmul.f32 0.5, %v165_v27  ;;  %v233_v33 = vmul.f32 0.5, %v197_v28  ;;  %v186_v34 = vadd.f32 %v625_v30, %v585_v10 }
  0xd4   :  { %v177_v36 = vpop.f32.mrf.mxu0  ;;  %v209_v37 = vpop.f32.mrf.mxu1  ;;  %v218_v56 = vadd.f32 %v633_v31, %v585_v10 }
  0xd5   :  { %658 = vtanh.f32 %v225_v32  ;;  %v230_v38 = vmul.f32 0.5, %v186_v34  ;;  %v178_v39 = vadd.f32 %v585_v10, %v177_v36  ;;  %v210_v47 = vadd.f32 %v585_v10, %v209_v37 }
  0xd6   :  { %660 = vtanh.f32 %v233_v33  ;;  %v626_v41 = vpop.f32.mrf.mxu0  ;;  %v634_v42 = vpop.f32.mrf.mxu1  ;;  %v238_v2 = vmul.f32 0.5, %v218_v56 }
  0xd7   :  { %662 = vtanh.f32 %v230_v38  ;;  %v228_v43 = vmul.f32 0.5, %v178_v39  ;;  %v189_v44 = vadd.f32 %v626_v41, %v585_v10  ;;  %v221_v52 = vadd.f32 %v634_v42, %v585_v10 }
  0xd8   :  { %v180_v46 = vpop.f32.mrf.mxu0  ;;  %v212_v48 = vpop.f32.mrf.mxu1  ;;  %v236_v57 = vmul.f32 0.5, %v210_v47 }
  0xd9   :  { %664 = vtanh.f32 %v228_v43  ;;  %v231_v49 = vmul.f32 0.5, %v189_v44  ;;  %v181_v50 = vadd.f32 %v585_v10, %v180_v46  ;;  %v213_v51 = vadd.f32 %v585_v10, %v212_v48 }
  0xda   :  { %666 = vtanh.f32 %v235_v40  ;;  %v239_v60 = vmul.f32 0.5, %v221_v52 }
  0xdb   :  { %668 = vtanh.f32 %v231_v49  ;;  %v229_v53 = vmul.f32 0.5, %v181_v50  ;;  %v237_v54 = vmul.f32 0.5, %v213_v51 }
  0xdc   :  { %v651_v55 = vpop.eup %650  ;;  %670 = vtanh.f32 %v234_v45 }
  0xdd   :  { %672 = vtanh.f32 %v229_v53  ;;  %v258_v58 = vadd.f32 1.0, %v651_v55 }
  0xde   :  { %v653_v59 = vpop.eup %652  ;;  %674 = vtanh.f32 %v237_v54 }
  0xdf   :  { %v655_v62 = vpop.eup %654  ;;  %v274_v63 = vmul.f32 0.5, %v258_v58  ;;  %v256_v0 = vadd.f32 1.0, %v653_v59  ;;  %676 = vtanh.f32 %v236_v57 }
  0xe0   :  { %v657_v1 = vpop.eup %656  ;;  %v264_v3 = vadd.f32 1.0, %v655_v62  ;;  %678 = vtanh.f32 %v239_v60 }
  0xe1   :  { %v297_v4 = vmul.f32 %v811_v61, %v274_v63  ;;  %v272_v5 = vmul.f32 0.5, %v256_v0  ;;  %v259_v6 = vadd.f32 1.0, %v657_v1  ;;  %680 = vtanh.f32 %v238_v2 }
  0xe2   :  { %v659_v7 = vpop.eup %658  ;;  %v280_v8 = vmul.f32 0.5, %v264_v3 }
  0xe3   :  { %v661_v9 = vpop.eup %660  ;;  %v318_v10 = vsel %vm311_vm1, %v297_v4, 0.0  ;;  %v295_v11 = vmul.f32 %v811_v61, %v272_v5  ;;  %v275_v12 = vmul.f32 0.5, %v259_v6  ;;  %v257_v13 = vadd.f32 1.0, %v659_v7 }
  0xe4   :  { %v663_v14 = vpop.eup %662  ;;  %319 = vadd.xlane.f32.xlu1 %v318_v10  ;;  %v303_v15 = vmul.f32 %v811_v61, %v280_v8  ;;  %v265_v16 = vadd.f32 1.0, %v661_v9 }
  0xe5   :  { %v312_v17 = vsel %vm311_vm1, %v295_v11, 0.0  ;;  %v298_v18 = vmul.f32 %v811_v61, %v275_v12  ;;  %v273_v19 = vmul.f32 0.5, %v257_v13  ;;  %v262_v20 = vadd.f32 1.0, %v663_v14 }
  0xe6   :  { %v665_v21 = vpop.eup %664  ;;  %313 = vadd.xlane.f32.xlu0 %v312_v17  ;;  %v281_v22 = vmul.f32 0.5, %v265_v16  ;;  %v336_v29 = vsel %vm311_vm1, %v303_v15, 0.0  ;;  %v848_v14 = vstv %s958_s4  ;;  %s736_s4 = smov [#allocation3]  }
  0xe7   :  { %v667_v23 = vpop.eup %666  ;;  %v321_v24 = vsel %vm311_vm1, %v298_v18, 0.0  ;;  %v296_v27 = vmul.f32 %v811_v61, %v273_v19  ;;  %v278_v31 = vmul.f32 0.5, %v262_v20  ;;  %v260_v32 = vadd.f32 1.0, %v665_v21  ;;  %s577_s15 = sshll.u32 %s736_s4, 4  ;;  %s578_s15 = int_to_ptr.vmem [resolvable:$true] %s577_s15 }
  0xe8   :  { %v669_v25 = vpop.eup %668  ;;  %322 = vadd.xlane.f32.xlu1 %v321_v24  ;;  %v304_v26 = vmul.f32 %v811_v61, %v281_v22  ;;  %v267_v37 = vadd.f32 1.0, %v667_v23  ;;  %s714_s16 = scalar_lea.vmem %s578_s15, 16  ;;  %s718_s17 = scalar_lea.vmem %s578_s15, 32 }
  0xe9   :  { %v671_v28 = vpop.eup %670  ;;  %v263_v30 = vadd.f32 1.0, %v669_v25  ;;  %v315_v39 = vsel %vm311_vm1, %v296_v27, 0.0  ;;  %v301_v42 = vmul.f32 %v811_v61, %v278_v31  ;;  %v276_v44 = vmul.f32 0.5, %v260_v32  ;;  %p715_p0 = scmp.ne.s32.totalorder %s578_s15, %s714_s16  ;;  %p719_p1 = scmp.lt.s32.totalorder %s578_s15, %s578_s15 }
  0xea   :  { %v673_v33 = vpop.eup %672  ;;  %337 = vadd.xlane.f32.xlu0 %v336_v29  ;;  %v339_v34 = vsel %vm311_vm1, %v304_v26, 0.0  ;;  %v266_v40 = vadd.f32 1.0, %v671_v28  ;;  %v283_v49 = vmul.f32 0.5, %v267_v37  ;;  %v458_v25 = vlaneseq  ;;  %p720_p2 = scmp.lt.s32.totalorder %s718_s17, %s714_s16 }
  0xeb   :  { %v279_v35 = vmul.f32 0.5, %v263_v30  ;;  %v261_v36 = vadd.f32 1.0, %v673_v33  ;;  %v675_v38 = vpop.eup %674  ;;  %v330_v52 = vsel %vm311_vm1, %v301_v42, 0.0  ;;  %v299_v53 = vmul.f32 %v811_v61, %v276_v44 }
  0xec   :  { %340 = vadd.xlane.f32.xlu1 %v339_v34  ;;  %v677_v45 = vpop.eup %676  ;;  %v269_v50 = vadd.f32 1.0, %v675_v38  ;;  %v282_v54 = vmul.f32 0.5, %v266_v40  ;;  %v306_v57 = vmul.f32 %v811_v61, %v283_v49  ;;  %v857_v34 = vand.u32 127, %v458_v25  ;;  %p721_p3 = por %p720_p2, %p719_p1 }
  0xed   :  { %v302_v41 = vmul.f32 %v811_v61, %v279_v35  ;;  %v277_v43 = vmul.f32 0.5, %v261_v36  ;;  %v679_v46 = vpop.eup %678  ;;  %v268_v55 = vadd.f32 1.0, %v677_v45  ;;  %v324_v60 = vsel %vm311_vm1, %v299_v53, 0.0 }
  0xee   :  { %316 = vadd.xlane.f32.xlu0 %v315_v39  ;;  %v681_v51 = vpop.eup %680  ;;  %v285_v58 = vmul.f32 0.5, %v269_v50  ;;  %v271_v59 = vadd.f32 1.0, %v679_v46  ;;  %v305_v62 = vmul.f32 %v811_v61, %v282_v54  ;;  %v345_v1 = vsel %vm311_vm1, %v306_v57, 0.0  ;;  %p722_p4 = pnand %p721_p3, %p715_p0 }
  0xef   :  { %v333_v47 = vsel %vm311_vm1, %v302_v41, 0.0  ;;  %v300_v48 = vmul.f32 %v811_v61, %v277_v43  ;;  %v284_v63 = vmul.f32 0.5, %v268_v55  ;;  %v270_v0 = vadd.f32 1.0, %v681_v51 }
  0xf0   :  { %334 = vadd.xlane.f32.xlu1 %v333_v47  ;;  %v308_v2 = vmul.f32 %v811_v61, %v285_v58  ;;  %v287_v3 = vmul.f32 0.5, %v271_v59  ;;  %v342_v4 = vsel %vm311_vm1, %v305_v62, 0.0  ;;  %v861_v40 = vshrl.u32 %v458_v25, 7 }
  0xf1   :  { %v327_v56 = vsel %vm311_vm1, %v300_v48, 0.0  ;;  %v307_v5 = vmul.f32 %v811_v61, %v284_v63  ;;  %v286_v6 = vmul.f32 0.5, %v270_v0  ;;  %v864_v43 = vadd.s32 4294967280, %v857_v34 }
  0xf2   :  { %331 = vadd.xlane.f32.xlu0 %v330_v52  ;;  %v351_v7 = vsel %vm311_vm1, %v308_v2, 0.0  ;;  %v310_v8 = vmul.f32 %v811_v61, %v287_v3  ;;  %v868_v47 = vadd.s32 4294967272, %v857_v34  ;;  %v871_v48 = vadd.s32 4294967232, %v857_v34 }
  0xf3   :  { %v348_v9 = vsel %vm311_vm1, %v307_v5, 0.0  ;;  %v309_v10 = vmul.f32 %v811_v61, %v286_v6  ;;  %v474_v53 = vsub.s32 %v864_v43, %v861_v40  ;;  %v877_v54 = vadd.s32 4294967224, %v857_v34 }
  0xf4   :  { %328 = vadd.xlane.f32.xlu1 %v327_v56  ;;  %v357_v11 = vsel %vm311_vm1, %v310_v8, 0.0  ;;  %v462_v55 = vsub.s32 %v857_v34, %v861_v40  ;;  %v464_v56 = vadd.s32 4294967288, %v857_v34  ;;  %v516_v62 = vsub.s32 %v871_v48, %v861_v40 }
  0xf5   :  { %v354_v12 = vsel %vm311_vm1, %v309_v10, 0.0  ;;  %v888_v63 = vadd.s32 4294967240, %v857_v34  ;;  %v892_v3 = vadd.s32 4294967248, %v857_v34  ;;  %v523_v6 = vsub.s32 %v877_v54, %v861_v40 }
  0xf6   :  { %325 = vadd.xlane.f32.xlu0 %v324_v60  ;;  %v481_v60 = vsub.s32 %v868_v47, %v861_v40  ;;  %v467_v10 = vsub.s32 %v464_v56, %v861_v40  ;;  %v562_v48 = vadd.s32 4294967176, %v857_v34 }
  0xf8   :  { %346 = vadd.xlane.f32.xlu1 %v345_v1 }
  0xfa   :  { %343 = vadd.xlane.f32.xlu0 %v342_v4 }
  0xfc   :  { %352 = vadd.xlane.f32.xlu1 %v351_v7  ;;  %v897_v7 = vadd.s32 4294967256, %v857_v34 }
  0xfe   :  { %349 = vadd.xlane.f32.xlu0 %v348_v9 }
 0x100   :  { %358 = vadd.xlane.f32.xlu1 %v357_v11 }
 0x102   :  { %355 = vadd.xlane.f32.xlu0 %v354_v12 }
 0x16d   :  { %v320_v13 = vpop.xlane.xlu1 %319 }
 0x16e   :  { %v364_v18 = vadd.f32 %v848_v14, %v320_v13 }
 0x16f   :  { %v314_v15 = vpop.xlane.xlu0 %313 }
 0x170   :  { %v362_v16 = vadd.f32 %v848_v14, %v314_v15  ;;  %v380_v22 = vmul.f32 0.5, %v364_v18 }
 0x171   :  { %v323_v17 = vpop.xlane.xlu1 %322 }
 0x172   :  { %v378_v61 = vmul.f32 0.5, %v362_v16  ;;  %v365_v20 = vadd.f32 %v848_v14, %v323_v17  ;;  %v509_v17 = vsub.s32 %v888_v63, %v861_v40 }
 0x173   :  { %v338_v19 = vpop.xlane.xlu0 %337 }
 0x174   :  { %682 = vtanh.f32 %v378_v61  ;;  %v370_v23 = vadd.f32 %v848_v14, %v338_v19  ;;  %v381_v27 = vmul.f32 0.5, %v365_v20  ;;  %v502_v61 = vsub.s32 %v892_v3, %v861_v40 }
 0x175   :  { %v341_v21 = vpop.xlane.xlu1 %340  ;;  %684 = vtanh.f32 %v380_v22  ;;  %v548_v3 = vadd.s32 4294967192, %v857_v34 }
 0x176   :  { %v386_v31 = vmul.f32 0.5, %v370_v23  ;;  %v371_v32 = vadd.f32 %v848_v14, %v341_v21 }
 0x177   :  { %v317_v24 = vpop.xlane.xlu0 %316 }
 0x178   :  { %v363_v26 = vadd.f32 %v848_v14, %v317_v24  ;;  %v387_v41 = vmul.f32 0.5, %v371_v32  ;;  %v495_v24 = vsub.s32 %v897_v7, %v861_v40 }
 0x179   :  { %v335_v28 = vpop.xlane.xlu1 %334 }
 0x17a   :  { %v379_v29 = vmul.f32 0.5, %v363_v26  ;;  %v369_v30 = vadd.f32 %v848_v14, %v335_v28  ;;  %v485_v28 = vadd.s32 4294967264, %v857_v34 }
 0x17b   :  { %v332_v33 = vpop.xlane.xlu0 %331 }
 0x17c   :  { %686 = vtanh.f32 %v379_v29  ;;  %v368_v35 = vadd.f32 %v848_v14, %v332_v33  ;;  %v385_v36 = vmul.f32 0.5, %v369_v30 }
 0x17d   :  { %688 = vtanh.f32 %v381_v27  ;;  %v329_v37 = vpop.xlane.xlu1 %328 }
 0x17e   :  { %v384_v38 = vmul.f32 0.5, %v368_v35  ;;  %v367_v39 = vadd.f32 %v848_v14, %v329_v37  ;;  %690 = vtanh.f32 %v386_v31  ;;  %v911_v37 = vadd.s32 4294967208, %v857_v34 }
 0x17f   :  { %v326_v42 = vpop.xlane.xlu0 %325 }
 0x180   :  { %692 = vtanh.f32 %v384_v38  ;;  %v383_v44 = vmul.f32 0.5, %v367_v39  ;;  %v366_v45 = vadd.f32 %v848_v14, %v326_v42  ;;  %v527_v38 = vadd.s32 4294967216, %v857_v34 }
 0x181   :  { %694 = vtanh.f32 %v385_v36  ;;  %v347_v46 = vpop.xlane.xlu1 %346  ;;  %v683_v52 = vpop.eup %682 }
 0x182   :  { %696 = vtanh.f32 %v383_v44  ;;  %v382_v49 = vmul.f32 0.5, %v366_v45  ;;  %v373_v50 = vadd.f32 %v848_v14, %v347_v46  ;;  %v685_v1 = vpop.eup %684  ;;  %v410_v2 = vadd.f32 1.0, %v683_v52 }
 0x183   :  { %698 = vtanh.f32 %v387_v41  ;;  %v344_v51 = vpop.xlane.xlu0 %343  ;;  %v412_v15 = vadd.f32 1.0, %v685_v1 }
 0x184   :  { %700 = vtanh.f32 %v382_v49  ;;  %v389_v57 = vmul.f32 0.5, %v373_v50  ;;  %v372_v58 = vadd.f32 %v848_v14, %v344_v51  ;;  %v426_v18 = vmul.f32 0.5, %v410_v2 }
 0x185   :  { %v353_v59 = vpop.xlane.xlu1 %352  ;;  %v428_v31 = vmul.f32 0.5, %v412_v15  ;;  %v488_v51 = vsub.s32 %v485_v28, %v861_v40 }
 0x186   :  { %v375_v0 = vadd.f32 %v848_v14, %v353_v59  ;;  %702 = vtanh.f32 %v389_v57  ;;  %v388_v4 = vmul.f32 0.5, %v372_v58  ;;  %v463_v36 = vrot.slane %v426_v18, %v462_v55 }
 0x187   :  { %v350_v5 = vpop.xlane.xlu0 %349  ;;  %v475_v49 = vrot.slane %v428_v31, %v474_v53  ;;  %v537_v57 = vsub.s32 %v911_v37, %v861_v40  ;;  %v530_v58 = vsub.s32 %v527_v38, %v861_v40 }
 0x188   :  { %v391_v8 = vmul.f32 0.5, %v375_v0  ;;  %704 = vtanh.f32 %v388_v4  ;;  %v374_v11 = vadd.f32 %v848_v14, %v350_v5 }
 0x189   :  { %v687_v9 = vpop.eup %686  ;;  %v359_v12 = vpop.xlane.xlu1 %358 }
 0x18a   :  { %v689_v13 = vpop.eup %688  ;;  %v411_v16 = vadd.f32 1.0, %v687_v9  ;;  %706 = vtanh.f32 %v391_v8  ;;  %v390_v19 = vmul.f32 0.5, %v374_v11  ;;  %v377_v20 = vadd.f32 %v848_v14, %v359_v12 }
 0x18b   :  { %v356_v21 = vpop.xlane.xlu0 %355  ;;  %v691_v22 = vpop.eup %690  ;;  %v413_v27 = vadd.f32 1.0, %v689_v13  ;;  %v541_v9 = vadd.s32 4294967200, %v857_v34 }
 0x18c   :  { %v427_v23 = vmul.f32 0.5, %v411_v16  ;;  %v376_v25 = vadd.f32 %v848_v14, %v356_v21  ;;  %708 = vtanh.f32 %v390_v19  ;;  %v393_v29 = vmul.f32 0.5, %v377_v20 }
 0x18d   :  { %v693_v26 = vpop.eup %692  ;;  %v429_v44 = vmul.f32 0.5, %v413_v27  ;;  %v418_v50 = vadd.f32 1.0, %v691_v22 }
 0x18e   :  { %v695_v30 = vpop.eup %694  ;;  %v468_v32 = vrot.slane %v427_v23, %v467_v10  ;;  %v392_v33 = vmul.f32 0.5, %v376_v25  ;;  %710 = vtanh.f32 %v393_v29  ;;  %v416_v39 = vadd.f32 1.0, %v693_v26 }
 0x18f   :  { %v697_v35 = vpop.eup %696  ;;  %v417_v46 = vadd.f32 1.0, %v695_v30  ;;  %v482_v43 = vrot.slane %v429_v44, %v481_v60  ;;  %v434_v7 = vmul.f32 0.5, %v418_v50  ;;  %v555_v26 = vadd.s32 4294967184, %v857_v34 }
 0x190   :  { %v699_v14 = vpop.eup %698  ;;  %v415_v41 = vadd.f32 1.0, %v697_v35  ;;  %v470_v45 = vsel %vm469_vm2, %v468_v32, %v463_v36  ;;  %712 = vtanh.f32 %v392_v33  ;;  %v432_v1 = vmul.f32 0.5, %v416_v39 }
 0x191   :  { %v701_v42 = vpop.eup %700  ;;  %v419_v55 = vadd.f32 1.0, %v699_v14  ;;  %v477_v0 = vsel %vm476_vm3, %v475_v49, %v470_v45  ;;  %v433_v53 = vmul.f32 0.5, %v417_v46  ;;  %v517_v22 = vrot.slane %v434_v7, %v516_v62 }
 0x192   :  { %v414_v52 = vadd.f32 1.0, %v701_v42  ;;  %v431_v56 = vmul.f32 0.5, %v415_v41  ;;  %v484_v13 = vsel %vm483_vm4, %v482_v43, %v477_v0  ;;  %v503_v16 = vrot.slane %v432_v1, %v502_v61 }
 0x193   :  { %v703_v59 = vpop.eup %702  ;;  %v435_v11 = vmul.f32 0.5, %v419_v55  ;;  %v510_v47 = vrot.slane %v433_v53, %v509_v17  ;;  %v558_v37 = vsub.s32 %v555_v26, %v861_v40  ;;  %v565_v34 = vsub.s32 %v562_v48, %v861_v40 }
 0x194   :  { %v430_v2 = vmul.f32 0.5, %v414_v52  ;;  %v421_v4 = vadd.f32 1.0, %v703_v59  ;;  %v496_v12 = vrot.slane %v431_v56, %v495_v24  ;;  %v544_v24 = vsub.s32 %v541_v9, %v861_v40 }
 0x195   :  { %v705_v5 = vpop.eup %704  ;;  %v524_v25 = vrot.slane %v435_v11, %v523_v6  ;;  %v551_v6 = vsub.s32 %v548_v3, %v861_v40 }
 0x196   :  { %v489_v8 = vrot.slane %v430_v2, %v488_v51  ;;  %v420_v15 = vadd.f32 1.0, %v705_v5  ;;  %v437_v19 = vmul.f32 0.5, %v421_v4 }
 0x197   :  { %v707_v10 = vpop.eup %706 }
 0x198   :  { %v491_v18 = vsel %vm490_vm5, %v489_v8, %v484_v13  ;;  %v436_v20 = vmul.f32 0.5, %v420_v15  ;;  %v423_v61 = vadd.f32 1.0, %v707_v10  ;;  %v538_v62 = vrot.slane %v437_v19, %v537_v57 }
 0x199   :  { %v498_v60 = vsel %vm497_vm6, %v496_v12, %v491_v18  ;;  %v709_v21 = vpop.eup %708 }
 0x19a   :  { %v505_v23 = vsel %vm504_vm7, %v503_v16, %v498_v60  ;;  %v422_v17 = vadd.f32 1.0, %v709_v21  ;;  %v531_v29 = vrot.slane %v436_v20, %v530_v58  ;;  %v439_v35 = vmul.f32 0.5, %v423_v61 }
 0x19b   :  { %v512_v63 = vsel %vm511_vm8, %v510_v47, %v505_v23  ;;  %v711_v27 = vpop.eup %710 }
 0x19c   :  { %v519_v28 = vsel %vm518_vm9, %v517_v22, %v512_v63  ;;  %v438_v31 = vmul.f32 0.5, %v422_v17  ;;  %v425_v32 = vadd.f32 1.0, %v711_v27  ;;  %v552_v44 = vrot.slane %v439_v35, %v551_v6 }
 0x19d   :  { %v526_v30 = vsel %vm525_vm10, %v524_v25, %v519_v28  ;;  %v713_v33 = vpop.eup %712 }
 0x19e   :  { %v533_v54 = vsel %vm532_vm11, %v531_v29, %v526_v30  ;;  %v545_v36 = vrot.slane %v438_v31, %v544_v24  ;;  %v424_v38 = vadd.f32 1.0, %v713_v33  ;;  %v441_v39 = vmul.f32 0.5, %v425_v32 }
 0x19f   :  { %v540_v14 = vsel %vm539_vm12, %v538_v62, %v533_v54 }
 0x1a0   :  { %v440_v41 = vmul.f32 0.5, %v424_v38  ;;  %v547_v42 = vsel %vm546_vm13, %v545_v36, %v540_v14  ;;  %v566_v49 = vrot.slane %v441_v39, %v565_v34 }
 0x1a1   :  { %v554_v46 = vsel %vm553_vm14, %v552_v44, %v547_v42 }
 0x1a2   :  { %v559_v45 = vrot.slane %v440_v41, %v558_v37 }
 0x1a4   :  { %v561_v50 = vsel %vm560_vm15, %v559_v45, %v554_v46 }
 0x1a5   :  { %v568_v51 = vsel %vm567_vm0, %v566_v49, %v561_v50 }
 0x1a6   :  { %570 = vst [vmem:[#allocation3] sm:$0x1] %v568_v51 }
 0x1a7   :  { %725 = shalt.err (!%p722_p4)
}
 0x1a8   :  { %580 = dma.vmem_to_hbm [thread:$0]  %s578_s15, 16, %s959_s5, [#allocation4]  }
 0x1a9   :  { %734 = dma.done.wait [#allocation4], 16  }
 0x1aa   :  { %735 = vsyncadd [#allocation4], 4294967280 }
 0x1ab   :  { %584 = vsyncpa [#allocation4], 1 }

</bundles_post_ra>
